<compile_context>
chip_gen: v6e
topology: v6e:2x2x1
jax: 0.10.0
libtpu: 0.0.40
codegen_flags: <defaults>
</compile_context>

<pallas_src>
import math

import jax
import jax.numpy as jnp
from jax.experimental import pallas as pl
from jax.experimental.pallas import tpu as pltpu

# `layers` is a module-level global in the reference script; use H2-reactor-style
# sizes (in -> hidden -> hidden -> out).
LAYERS = [16, 64, 64, 32]

_TORCH_PI = 3.1415926536
_SQRT_2_OVER_PI = math.sqrt(2.0 / _TORCH_PI)

TILE_B = 2048   # batch rows per grid step (multiple of 8); amortizes per-step overhead


def _my_gelu_f32(x):
    # 0.5 * x * (1 + tanh(sqrt(2/pi) * (x + 0.044715 * x^3)))  -- exactly MyGELU.forward
    x2 = x * x                          # reuse x^2 for the cube (fewer VALU ops)
    inner = x + 0.044715 * (x2 * x)
    return 0.5 * x * (1.0 + jnp.tanh(_SQRT_2_OVER_PI * inner))


def _mlp_kernel(x_ref, *refs):
    """refs = (w0, b0, w1, b1, ..., out_ref). One batch tile per grid step.
    All math in f32; hidden activations stay in VMEM/vregs only."""
    out_ref = refs[-1]
    wb_refs = refs[:-1]
    n_layers = len(wb_refs) // 2

    h = x_ref[...]                                   # (TILE_B, in), f32
    for i in range(n_layers):
        w = wb_refs[2 * i][...]                      # (in_i, out_i), f32
        b = wb_refs[2 * i + 1][...]                  # (1, out_i), f32 -> broadcasts over batch
        y = jnp.dot(h, w, preferred_element_type=jnp.float32) + b
        if i < n_layers - 1:
            h = _my_gelu_f32(y)                      # hidden: GELU (EUP tanh), f32
        else:
            out_ref[...] = y.astype(out_ref.dtype)   # last Linear: raw


def make_params(key, layer_sizes):
    """PyTorch-Linear-style init: W,b ~ U(-k, k), k = 1/sqrt(fan_in).
    W already transposed to (in, out); b is (1, out)."""
    params = []
    for i in range(len(layer_sizes) - 1):
        fan_in, fan_out = layer_sizes[i], layer_sizes[i + 1]
        key, kw, kb = jax.random.split(key, 3)
        bound = 1.0 / math.sqrt(fan_in)
        w = jax.random.uniform(kw, (fan_in, fan_out), jnp.float32, -bound, bound)
        b = jax.random.uniform(kb, (1, fan_out), jnp.float32, -bound, bound)
        params.append((w, b))
    return params


def mlp_forward(x, params, *, tile_b=TILE_B):
    batch, in_dim = x.shape
    out_dim = params[-1][0].shape[1]

    x = x.astype(jnp.float32)

    # Pad batch to a multiple of the tile (zero rows; row-sliced off afterwards only
    # if padding was actually needed). No lane/feature padding anywhere.
    padded_batch = max(8, pl.cdiv(batch, 8) * 8)
    tile_b = min(tile_b, padded_batch)
    padded_batch = pl.cdiv(padded_batch, tile_b) * tile_b
    if padded_batch != batch:
        x = jnp.pad(x, ((0, padded_batch - batch), (0, 0)))

    grid = (padded_batch // tile_b,)

    flat_inputs = [x]
    in_specs = [pl.BlockSpec((tile_b, in_dim), lambda i: (i, 0))]
    for w, b in params:
        flat_inputs += [w.astype(jnp.float32), b.astype(jnp.float32)]
        # Constant index_map -> weights/biases stay VMEM-resident across the grid.
        in_specs += [pl.BlockSpec(w.shape, lambda i: (0, 0)),
                     pl.BlockSpec(b.shape, lambda i: (0, 0))]

    flops = 2 * padded_batch * sum(w.shape[0] * w.shape[1] for w, _ in params)
    transcendentals = padded_batch * sum(w.shape[1] for w, _ in params[:-1])
    bytes_accessed = int(padded_batch * in_dim * 4          # x read
                         + padded_batch * out_dim * 4       # out write (unpadded)
                         + sum(w.size * 4 + b.size * 4 for w, b in params))

    out_padded = pl.pallas_call(
        _mlp_kernel,
        out_shape=jax.ShapeDtypeStruct((padded_batch, out_dim), jnp.float32),
        grid=grid,
        in_specs=in_specs,
        # out block spans the full (unpadded) array width -> contiguous HBM writeback.
        out_specs=pl.BlockSpec((tile_b, out_dim), lambda i: (i, 0)),
        compiler_params=pltpu.CompilerParams(
            dimension_semantics=("parallel",),       # pipelining / megacore sharding
            vmem_limit_bytes=32 * 1024 * 1024,       # plenty of headroom on all gens
        ),
        cost_estimate=pl.CostEstimate(flops=flops,
                                      transcendentals=transcendentals,
                                      bytes_accessed=bytes_accessed),
    )(*flat_inputs)

    if padded_batch != batch:
        return out_padded[:batch]   # row slice only when padding was required
    return out_padded


def mlp_reference(x, params):
    """Pure-JAX f32 reference (mirrors Net.forward) for a correctness check."""
    h = x.astype(jnp.float32)
    n = len(params)
    for i, (w, b) in enumerate(params):
        h = h @ w + b
        if i < n - 1:
            h = _my_gelu_f32(h)
    return h


if __name__ == "__main__":
    key = jax.random.PRNGKey(0)
    key, kx = jax.random.split(key)

    batch = 100   # small demo shape; not a multiple of 8 -> exercises the row-padding path
    x = jax.random.normal(kx, (batch, LAYERS[0]), jnp.float32)
    params = make_params(key, LAYERS)

    out = jax.block_until_ready(mlp_forward(x, params))
    ref = mlp_reference(x, params)

    assert out.shape == (batch, LAYERS[-1])
    # f32 end-to-end in the kernel -> tight tolerance vs. the pure-JAX reference
    assert jnp.allclose(out, ref, atol=2e-4, rtol=2e-4), "Pallas output mismatch vs reference"

    print("KERNEL_OK")
</pallas_src>

<mosaic_0001>
module attributes {stable_mosaic.version = 11 : i64} {
  func.func @_mlp_kernel(%arg0: i32, %arg1: memref<104x16xf32, #tpu.memory_space<vmem>>, %arg2: memref<16x64xf32, #tpu.memory_space<vmem>>, %arg3: memref<1x64xf32, #tpu.memory_space<vmem>>, %arg4: memref<64x64xf32, #tpu.memory_space<vmem>>, %arg5: memref<1x64xf32, #tpu.memory_space<vmem>>, %arg6: memref<64x32xf32, #tpu.memory_space<vmem>>, %arg7: memref<1x32xf32, #tpu.memory_space<vmem>>, %arg8: memref<104x32xf32, #tpu.memory_space<vmem>>) attributes {dimension_semantics = [#tpu.dimension_semantics<parallel>], iteration_bounds = array<i64: 1>, scalar_prefetch = 0 : i64, scratch_operands = 0 : i64, tpu.core_type = #tpu.core_type<tc>, window_params = [{transform_indices = @transform_0, window_bounds = array<i64: 104, 16>}, {pipeline_mode = #tpu.pipeline_mode<synchronous>, transform_indices = @transform_1, window_bounds = array<i64: 16, 64>}, {pipeline_mode = #tpu.pipeline_mode<synchronous>, transform_indices = @transform_2, window_bounds = array<i64: 1, 64>}, {pipeline_mode = #tpu.pipeline_mode<synchronous>, transform_indices = @transform_3, window_bounds = array<i64: 64, 64>}, {pipeline_mode = #tpu.pipeline_mode<synchronous>, transform_indices = @transform_4, window_bounds = array<i64: 1, 64>}, {pipeline_mode = #tpu.pipeline_mode<synchronous>, transform_indices = @transform_5, window_bounds = array<i64: 64, 32>}, {pipeline_mode = #tpu.pipeline_mode<synchronous>, transform_indices = @transform_6, window_bounds = array<i64: 1, 32>}, {transform_indices = @transform_7, window_bounds = array<i64: 104, 32>}]} {
    %c0 = arith.constant 0 : index
    %c0_0 = arith.constant 0 : index
    %0 = vector.load %arg1[%c0, %c0_0] : memref<104x16xf32, #tpu.memory_space<vmem>>, vector<104x16xf32>
    %c0_1 = arith.constant 0 : index
    %c0_2 = arith.constant 0 : index
    %1 = vector.load %arg2[%c0_1, %c0_2] : memref<16x64xf32, #tpu.memory_space<vmem>>, vector<16x64xf32>
    %c0_3 = arith.constant 0 : index
    %c0_4 = arith.constant 0 : index
    %2 = vector.load %arg3[%c0_3, %c0_4] : memref<1x64xf32, #tpu.memory_space<vmem>>, vector<1x64xf32>
    %cst = arith.constant dense<0.000000e+00> : vector<104x64xf32>
    %3 = tpu.matmul %0, %1, %cst {dimension_numbers = #tpu.dot_dimension_numbers<[1], [0], [0], [1], [0, 0, 1, 1], [], []>} : vector<104x16xf32>, vector<16x64xf32>, vector<104x64xf32> -> vector<104x64xf32>
    %4 = vector.broadcast %2 : vector<1x64xf32> to vector<104x64xf32>
    %5 = arith.addf %3, %4 : vector<104x64xf32>
    %6 = arith.mulf %5, %5 : vector<104x64xf32>
    %7 = arith.mulf %6, %5 : vector<104x64xf32>
    %cst_5 = arith.constant 4.471500e-02 : f32
    %8 = vector.broadcast %cst_5 : f32 to vector<104x64xf32>
    %9 = arith.mulf %8, %7 : vector<104x64xf32>
    %10 = arith.addf %5, %9 : vector<104x64xf32>
    %cst_6 = arith.constant 5.000000e-01 : f32
    %11 = vector.broadcast %cst_6 : f32 to vector<104x64xf32>
    %12 = arith.mulf %11, %5 : vector<104x64xf32>
    %cst_7 = arith.constant 0.797884583 : f32
    %13 = vector.broadcast %cst_7 : f32 to vector<104x64xf32>
    %14 = arith.mulf %13, %10 : vector<104x64xf32>
    %15 = math.tanh %14 : vector<104x64xf32>
    %cst_8 = arith.constant 1.000000e+00 : f32
    %16 = vector.broadcast %cst_8 : f32 to vector<104x64xf32>
    %17 = arith.addf %16, %15 : vector<104x64xf32>
    %18 = arith.mulf %12, %17 : vector<104x64xf32>
    %c0_9 = arith.constant 0 : index
    %c0_10 = arith.constant 0 : index
    %19 = vector.load %arg4[%c0_9, %c0_10] : memref<64x64xf32, #tpu.memory_space<vmem>>, vector<64x64xf32>
    %c0_11 = arith.constant 0 : index
    %c0_12 = arith.constant 0 : index
    %20 = vector.load %arg5[%c0_11, %c0_12] : memref<1x64xf32, #tpu.memory_space<vmem>>, vector<1x64xf32>
    %cst_13 = arith.constant dense<0.000000e+00> : vector<104x64xf32>
    %21 = tpu.matmul %18, %19, %cst_13 {dimension_numbers = #tpu.dot_dimension_numbers<[1], [0], [0], [1], [0, 0, 1, 1], [], []>} : vector<104x64xf32>, vector<64x64xf32>, vector<104x64xf32> -> vector<104x64xf32>
    %22 = vector.broadcast %20 : vector<1x64xf32> to vector<104x64xf32>
    %23 = arith.addf %21, %22 : vector<104x64xf32>
    %24 = arith.mulf %23, %23 : vector<104x64xf32>
    %25 = arith.mulf %24, %23 : vector<104x64xf32>
    %cst_14 = arith.constant 4.471500e-02 : f32
    %26 = vector.broadcast %cst_14 : f32 to vector<104x64xf32>
    %27 = arith.mulf %26, %25 : vector<104x64xf32>
    %28 = arith.addf %23, %27 : vector<104x64xf32>
    %cst_15 = arith.constant 5.000000e-01 : f32
    %29 = vector.broadcast %cst_15 : f32 to vector<104x64xf32>
    %30 = arith.mulf %29, %23 : vector<104x64xf32>
    %cst_16 = arith.constant 0.797884583 : f32
    %31 = vector.broadcast %cst_16 : f32 to vector<104x64xf32>
    %32 = arith.mulf %31, %28 : vector<104x64xf32>
    %33 = math.tanh %32 : vector<104x64xf32>
    %cst_17 = arith.constant 1.000000e+00 : f32
    %34 = vector.broadcast %cst_17 : f32 to vector<104x64xf32>
    %35 = arith.addf %34, %33 : vector<104x64xf32>
    %36 = arith.mulf %30, %35 : vector<104x64xf32>
    %c0_18 = arith.constant 0 : index
    %c0_19 = arith.constant 0 : index
    %37 = vector.load %arg6[%c0_18, %c0_19] : memref<64x32xf32, #tpu.memory_space<vmem>>, vector<64x32xf32>
    %c0_20 = arith.constant 0 : index
    %c0_21 = arith.constant 0 : index
    %38 = vector.load %arg7[%c0_20, %c0_21] : memref<1x32xf32, #tpu.memory_space<vmem>>, vector<1x32xf32>
    %cst_22 = arith.constant dense<0.000000e+00> : vector<104x32xf32>
    %39 = tpu.matmul %36, %37, %cst_22 {dimension_numbers = #tpu.dot_dimension_numbers<[1], [0], [0], [1], [0, 0, 1, 1], [], []>} : vector<104x64xf32>, vector<64x32xf32>, vector<104x32xf32> -> vector<104x32xf32>
    %40 = vector.broadcast %38 : vector<1x32xf32> to vector<104x32xf32>
    %41 = arith.addf %39, %40 : vector<104x32xf32>
    %c0_23 = arith.constant 0 : index
    %c0_24 = arith.constant 0 : index
    %42 = vector.load %arg8[%c0_23, %c0_24] : memref<104x32xf32, #tpu.memory_space<vmem>>, vector<104x32xf32>
    tpu.vector_store %arg8[%c0_23, %c0_24], %41 {strides = array<i32>} : memref<104x32xf32, #tpu.memory_space<vmem>>, vector<104x32xf32>,
    return
  }
  func.func @transform_0(%arg0: i32) -> (i32, i32) {
    %c0_i32 = arith.constant 0 : i32
    %c0_i32_0 = arith.constant 0 : i32
    return %arg0, %c0_i32 : i32, i32
  }
  func.func @transform_1(%arg0: i32) -> (i32, i32) {
    %c0_i32 = arith.constant 0 : i32
    %c0_i32_0 = arith.constant 0 : i32
    %c0_i32_1 = arith.constant 0 : i32
    return %c0_i32, %c0_i32_0 : i32, i32
  }
  func.func @transform_2(%arg0: i32) -> (i32, i32) {
    %c0_i32 = arith.constant 0 : i32
    %c0_i32_0 = arith.constant 0 : i32
    %c0_i32_1 = arith.constant 0 : i32
    return %c0_i32, %c0_i32_0 : i32, i32
  }
  func.func @transform_3(%arg0: i32) -> (i32, i32) {
    %c0_i32 = arith.constant 0 : i32
    %c0_i32_0 = arith.constant 0 : i32
    %c0_i32_1 = arith.constant 0 : i32
    return %c0_i32, %c0_i32_0 : i32, i32
  }
  func.func @transform_4(%arg0: i32) -> (i32, i32) {
    %c0_i32 = arith.constant 0 : i32
    %c0_i32_0 = arith.constant 0 : i32
    %c0_i32_1 = arith.constant 0 : i32
    return %c0_i32, %c0_i32_0 : i32, i32
  }
  func.func @transform_5(%arg0: i32) -> (i32, i32) {
    %c0_i32 = arith.constant 0 : i32
    %c0_i32_0 = arith.constant 0 : i32
    %c0_i32_1 = arith.constant 0 : i32
    return %c0_i32, %c0_i32_0 : i32, i32
  }
  func.func @transform_6(%arg0: i32) -> (i32, i32) {
    %c0_i32 = arith.constant 0 : i32
    %c0_i32_0 = arith.constant 0 : i32
    %c0_i32_1 = arith.constant 0 : i32
    return %c0_i32, %c0_i32_0 : i32, i32
  }
  func.func @transform_7(%arg0: i32) -> (i32, i32) {
    %c0_i32 = arith.constant 0 : i32
    %c0_i32_0 = arith.constant 0 : i32
    return %arg0, %c0_i32 : i32, i32
  }
}

</mosaic_0001>

<bundles_post_ra>
// kernel: tpu_custom_call.1
= control target key start
LH: loop header
LB: loop body
LE: loop exit
PB: predicated region body
PF: predicated region fallthrough
CT: control target
= control target key end

     0   :  { %v1149_v0 = vmov 0.0   ;;  %vm1150_vm0 = vmmov 0   ;;  %vm48_vm1 = vcmask 130048   ;;  %vm350_vm2 = vcmask 523264   ;;  %s1666_s1 = inlined_call_operand.vmem [shape: f32[16,64], index: 1, kind: input, shape index: {}]   ;;  %s1667_s0 = inlined_call_operand.vmem [shape: f32[104,16], index: 0, kind: input, shape index: {}]   ;;  %s1668_s3 = inlined_call_operand.vmem [shape: f32[64,64], index: 3, kind: input, shape index: {}]   ;;  %s1669_s2 = inlined_call_operand.vmem [shape: f32[1,64], index: 2, kind: input, shape index: {}]   ;;  %s1670_s5 = inlined_call_operand.vmem [shape: f32[64,32], index: 5, kind: input, shape index: {}]   ;;  %s1671_s4 = inlined_call_operand.vmem [shape: f32[1,64], index: 4, kind: input, shape index: {}]   ;;  %s1672_s6 = inlined_call_operand.vmem [shape: f32[1,32], index: 6, kind: input, shape index: {}]   ;;  %s1673_s7 = inlined_call_operand.vmem [shape: f32[104,32], index: 7, kind: output, shape index: {}]  }
   0x1   :  { %938 = vmatprep.subr.mxu0 %v1149_v0  ;;  %v40_v1 = vld [vmem:[%s1666_s1 + $0x8] sm:$0xff]  ;;  %v39_v2 = vld [vmem:[%s1666_s1] sm:$0xff]  ;;  %942 = vmatprep.mubr.msk.f32.mxu0 %vm1150_vm0, %v1149_v0  ;;  %v33_v4 = vld [vmem:[%s1667_s0 + $0x38] sm:$0xff]  ;;  %vm821_vm3 = vcmask 261120  }
   0x2   :  { %939 = vmatpush3.msra.mxu0 %v40_v1  ;;  %1091 = vmatprep.subr.mxu1 %v1149_v0  ;;  %v26_v3 = vld [vmem:[%s1667_s0] sm:$0xff]  ;;  %v27_v5 = vld [vmem:[%s1667_s0 + $0x8] sm:$0xff]  ;;  %v28_v7 = vld [vmem:[%s1667_s0 + $0x10] sm:$0xff] }
   0x3   :  { %940 = vmatprep.subr.mxu0 %v1149_v0  ;;  %1093 = vmatpush3.msra.mxu1 %v40_v1  ;;  %v34_v6 = vld [vmem:[%s1667_s0 + $0x40] sm:$0xff]  ;;  %v35_v8 = vld [vmem:[%s1667_s0 + $0x48] sm:$0xff]  ;;  %v29_v9 = vld [vmem:[%s1667_s0 + $0x18] sm:$0xff] }
   0x4   :  { %941 = vmatpush3.msra.mxu0 %v39_v2  ;;  %1092 = vmatprep.subr.mxu1 %v1149_v0  ;;  %v36_v10 = vld [vmem:[%s1667_s0 + $0x50] sm:$0xff]  ;;  %v30_v11 = vld [vmem:[%s1667_s0 + $0x20] sm:$0xff]  ;;  %v37_v12 = vld [vmem:[%s1667_s0 + $0x58] sm:$0xff] }
   0x5   :  { %943 = vmatmul.mubr.msk.f32.vlgmr.msra.gmra.mxu0 %vm48_vm1, %v26_v3  ;;  %1094 = vmatpush3.msra.mxu1 %v39_v2  ;;  %v31_v13 = vld [vmem:[%s1667_s0 + $0x28] sm:$0xff]  ;;  %v38_v14 = vld [vmem:[%s1667_s0 + $0x60] sm:$0xff]  ;;  %v32_v15 = vld [vmem:[%s1667_s0 + $0x30] sm:$0xff] }
   0x6   :  { %945 = vmatprep.mubr.msk.f32.mxu0 %vm1150_vm0, %v1149_v0  ;;  %963 = vmatprep.mubr.msk.f32.mxu1 %vm1150_vm0, %v1149_v0  ;;  %v342_v16 = vld [vmem:[%s1668_s3 + $0x38] sm:$0xff]  ;;  %v341_v17 = vld [vmem:[%s1668_s3 + $0x30] sm:$0xff]  ;;  %v340_v18 = vld [vmem:[%s1668_s3 + $0x28] sm:$0xff] }
   0x7   :  { %964 = vmatmul.mubr.msk.f32.vlgmr.msra.gmra.mxu1 %vm48_vm1, %v33_v4  ;;  %981 = vmatprep.subr.mxu1 %v1149_v0  ;;  %v339_v19 = vld [vmem:[%s1668_s3 + $0x20] sm:$0xff]  ;;  %v338_v20 = vld [vmem:[%s1668_s3 + $0x18] sm:$0xff]  ;;  %v337_v21 = vld [vmem:[%s1668_s3 + $0x10] sm:$0xff] }
   0x8   :  { %966 = vmatprep.mubr.msk.f32.mxu1 %vm1150_vm0, %v1149_v0  ;;  %1036 = vmatprep.subr.mxu0 %v1149_v0  ;;  %v336_v22 = vld [vmem:[%s1668_s3 + $0x8] sm:$0xff]  ;;  %v335_v23 = vld [vmem:[%s1668_s3] sm:$0xff] }
   0x9   :  { %946 = vmatmul.mubr.msk.f32.gmra.mxu0 %vm48_vm1, %v27_v5  ;;  %982 = vmatpush3.msra.mxu1 %v342_v16  ;;  %v1319_v24 = vld [vmem:[%s1669_s2] ss:$0 sm:$0xff] }
   0xa   :  { %948 = vmatprep.mubr.msk.f32.mxu0 %vm1150_vm0, %v1149_v0  ;;  %983 = vmatprep.subr.mxu1 %v1149_v0 }
   0xb   :  { %967 = vmatmul.mubr.msk.f32.gmra.mxu1 %vm48_vm1, %v34_v6 }
   0xc   :  { %969 = vmatprep.mubr.msk.f32.mxu1 %vm1150_vm0, %v1149_v0  ;;  %984 = vmatpush3.msra.mxu1 %v341_v17 }
   0xd   :  { %949 = vmatmul.mubr.msk.f32.gmra.mxu0 %vm48_vm1, %v28_v7  ;;  %985 = vmatprep.subr.mxu1 %v1149_v0 }
   0xe   :  { %951 = vmatprep.mubr.msk.f32.mxu0 %vm1150_vm0, %v1149_v0  ;;  %986 = vmatpush3.msra.mxu1 %v340_v18 }
   0xf   :  { %970 = vmatmul.mubr.msk.f32.gmra.mxu1 %vm48_vm1, %v35_v8  ;;  %987 = vmatprep.subr.mxu1 %v1149_v0 }
  0x10   :  { %972 = vmatprep.mubr.msk.f32.mxu1 %vm1150_vm0, %v1149_v0  ;;  %988 = vmatpush3.msra.mxu1 %v339_v19 }
  0x11   :  { %952 = vmatmul.mubr.msk.f32.gmra.mxu0 %vm48_vm1, %v29_v9  ;;  %989 = vmatprep.subr.mxu1 %v1149_v0 }
  0x12   :  { %954 = vmatprep.mubr.msk.f32.mxu0 %vm1150_vm0, %v1149_v0  ;;  %990 = vmatpush3.msra.mxu1 %v338_v20 }
  0x13   :  { %973 = vmatmul.mubr.msk.f32.gmra.mxu1 %vm48_vm1, %v36_v10  ;;  %991 = vmatprep.subr.mxu1 %v1149_v0 }
  0x14   :  { %975 = vmatprep.mubr.msk.f32.mxu1 %vm1150_vm0, %v1149_v0  ;;  %992 = vmatpush3.msra.mxu1 %v337_v21 }
  0x15   :  { %955 = vmatmul.mubr.msk.f32.gmra.mxu0 %vm48_vm1, %v30_v11  ;;  %993 = vmatprep.subr.mxu1 %v1149_v0 }
  0x16   :  { %957 = vmatprep.mubr.msk.f32.mxu0 %vm1150_vm0, %v1149_v0  ;;  %994 = vmatpush3.msra.mxu1 %v336_v22 }
  0x17   :  { %976 = vmatmul.mubr.msk.f32.gmra.mxu1 %vm48_vm1, %v37_v12  ;;  %995 = vmatprep.subr.mxu1 %v1149_v0 }
  0x18   :  { %978 = vmatprep.mubr.msk.f32.mxu1 %vm1150_vm0, %v1149_v0  ;;  %996 = vmatpush3.msra.mxu1 %v335_v23 }
  0x19   :  { %958 = vmatmul.mubr.msk.f32.gmra.mxu0 %vm48_vm1, %v31_v13 }
  0x1a   :  { %960 = vmatprep.mubr.msk.f32.mxu0 %vm1150_vm0, %v1149_v0 }
  0x1b   :  { %979 = vmatmul.mubr.msk.f32.gmra.mxu1 %vm48_vm1, %v38_v14 }
  0x1c   :  { %997 = vmatprep.mubr.msk.f32.mxu1 %vm1150_vm0, %v1149_v0 }
  0x1d   :  { %961 = vmatmul.mubr.msk.f32.gmra.mxu0 %vm48_vm1, %v32_v15 }
  0x1e   :  { %1052 = vmatprep.mubr.msk.f32.mxu0 %vm1150_vm0, %v1149_v0 }
  0xc5   :  { %v154_v25 = vpop.f32.mrf.mxu0 }
  0xc6   :  { %v1322_v26 = vadd.f32 %v1319_v24, %v154_v25 }
  0xc7   :  { %v944_v27 = vpop.f32.mrf.mxu0  ;;  %v189_v28 = vpop.f32.mrf.mxu1 }
  0xc8   :  { %v218_v29 = vmul.f32 %v1322_v26, %v1322_v26  ;;  %v1340_v48 = vadd.f32 %v1319_v24, %v189_v28 }
  0xc9   :  { %v159_v30 = vpop.f32.mrf.mxu0  ;;  %v965_v31 = vpop.f32.mrf.mxu1 }
  0xca   :  { %v231_v32 = vmul.f32 %v218_v29, %v1322_v26  ;;  %v1328_v33 = vadd.f32 %v1319_v24, %v159_v30  ;;  %v225_v58 = vmul.f32 %v1340_v48, %v1340_v48 }
  0xcb   :  { %v947_v34 = vpop.f32.mrf.mxu0  ;;  %v194_v35 = vpop.f32.mrf.mxu1 }
  0xcc   :  { %v244_v36 = vmul.f32 0.044715, %v231_v32  ;;  %v219_v37 = vmul.f32 %v1328_v33, %v1328_v33  ;;  %v1350_v59 = vadd.f32 %v1319_v24, %v194_v35  ;;  %v238_v7 = vmul.f32 %v225_v58, %v1340_v48 }
  0xcd   :  { %v164_v38 = vpop.f32.mrf.mxu0  ;;  %v968_v39 = vpop.f32.mrf.mxu1  ;;  %v270_v35 = vmul.f32 0.5, %v1322_v26 }
  0xce   :  { %v257_v40 = vadd.f32 %v244_v36, %v1322_v26  ;;  %v232_v41 = vmul.f32 %v219_v37, %v1328_v33  ;;  %v1335_v42 = vadd.f32 %v1319_v24, %v164_v38  ;;  %v226_v8 = vmul.f32 %v1350_v59, %v1350_v59 }
  0xcf   :  { %v950_v43 = vpop.f32.mrf.mxu0  ;;  %v199_v44 = vpop.f32.mrf.mxu1  ;;  %v251_v20 = vmul.f32 0.044715, %v238_v7 }
  0xd0   :  { %v283_v45 = vmul.f32 0.7978846, %v257_v40  ;;  %v245_v46 = vmul.f32 0.044715, %v232_v41  ;;  %v220_v47 = vmul.f32 %v1335_v42, %v1335_v42  ;;  %v1365_v12 = vadd.f32 %v1319_v24, %v199_v44 }
  0xd1   :  { %v169_v49 = vpop.f32.mrf.mxu0  ;;  %v971_v50 = vpop.f32.mrf.mxu1  ;;  %v239_v21 = vmul.f32 %v226_v8, %v1350_v59  ;;  %v264_v39 = vadd.f32 %v251_v20, %v1340_v48 }
  0xd2   :  { %1097 = vtanh.f32 %v283_v45  ;;  %v258_v51 = vadd.f32 %v245_v46, %v1328_v33  ;;  %v233_v52 = vmul.f32 %v220_v47, %v1335_v42  ;;  %v1345_v53 = vadd.f32 %v1319_v24, %v169_v49 }
  0xd3   :  { %v953_v54 = vpop.f32.mrf.mxu0  ;;  %v204_v55 = vpop.f32.mrf.mxu1  ;;  %v227_v27 = vmul.f32 %v1365_v12, %v1365_v12  ;;  %v252_v40 = vmul.f32 0.044715, %v239_v21  ;;  %v271_v50 = vmul.f32 0.5, %v1328_v33 }
  0xd4   :  { %v284_v56 = vmul.f32 0.7978846, %v258_v51  ;;  %v246_v57 = vmul.f32 0.044715, %v233_v52  ;;  %v221_v60 = vmul.f32 %v1345_v53, %v1345_v53  ;;  %v1383_v32 = vadd.f32 %v1319_v24, %v204_v55 }
  0xd5   :  { %v174_v61 = vpop.f32.mrf.mxu0  ;;  %v974_v62 = vpop.f32.mrf.mxu1  ;;  %v240_v44 = vmul.f32 %v227_v27, %v1365_v12  ;;  %v290_v54 = vmul.f32 0.7978846, %v264_v39 }
  0xd6   :  { %1099 = vtanh.f32 %v284_v56  ;;  %v259_v63 = vadd.f32 %v246_v57, %v1335_v42  ;;  %v1356_v1 = vadd.f32 %v1319_v24, %v174_v61  ;;  %v234_v2 = vmul.f32 %v221_v60, %v1345_v53 }
  0xd7   :  { %v956_v3 = vpop.f32.mrf.mxu0  ;;  %v209_v4 = vpop.f32.mrf.mxu1  ;;  %v228_v26 = vmul.f32 %v1383_v32, %v1383_v32  ;;  %v265_v56 = vadd.f32 %v252_v40, %v1350_v59  ;;  %v253_v57 = vmul.f32 0.044715, %v240_v44 }
  0xd8   :  { %v285_v5 = vmul.f32 0.7978846, %v259_v63  ;;  %v222_v6 = vmul.f32 %v1356_v1, %v1356_v1  ;;  %v247_v9 = vmul.f32 0.044715, %v234_v2  ;;  %v1394_v47 = vadd.f32 %v1319_v24, %v209_v4 }
  0xd9   :  { %v179_v10 = vpop.f32.mrf.mxu0  ;;  %v977_v11 = vpop.f32.mrf.mxu1  ;;  %v241_v61 = vmul.f32 %v228_v26, %v1383_v32  ;;  %v272_v2 = vmul.f32 0.5, %v1335_v42  ;;  %v274_v20 = vmul.f32 0.5, %v1356_v1 }
  0xda   :  { %1101 = vtanh.f32 %v285_v5  ;;  %v235_v13 = vmul.f32 %v222_v6, %v1356_v1  ;;  %v1369_v14 = vadd.f32 %v1319_v24, %v179_v10  ;;  %v260_v15 = vadd.f32 %v247_v9, %v1345_v53 }
  0xdb   :  { %v959_v16 = vpop.f32.mrf.mxu0  ;;  %v214_v17 = vpop.f32.mrf.mxu1  ;;  %v229_v33 = vmul.f32 %v1394_v47, %v1394_v47  ;;  %v291_v5 = vmul.f32 0.7978846, %v265_v56  ;;  %v266_v6 = vadd.f32 %v253_v57, %v1365_v12  ;;  %v254_v8 = vmul.f32 0.044715, %v241_v61 }
  0xdc   :  { %v248_v18 = vmul.f32 0.044715, %v235_v13  ;;  %v223_v19 = vmul.f32 %v1369_v14, %v1369_v14  ;;  %v286_v22 = vmul.f32 0.7978846, %v260_v15  ;;  %v1407_v63 = vadd.f32 %v1319_v24, %v214_v17 }
  0xdd   :  { %v184_v23 = vpop.f32.mrf.mxu0  ;;  %v980_v25 = vpop.f32.mrf.mxu1  ;;  %v242_v9 = vmul.f32 %v229_v33, %v1394_v47  ;;  %v273_v10 = vmul.f32 0.5, %v1345_v53  ;;  %v292_v13 = vmul.f32 0.7978846, %v266_v6  ;;  %v267_v16 = vadd.f32 %v254_v8, %v1383_v32  ;;  %v643_v33 = vld [vmem:[%s1670_s5 + $0x30] sm:$0xff]  ;;  %v1496_v6 = vld [vmem:[%s1671_s4] ss:$0 sm:$0xff] }
  0xde   :  { %v261_v28 = vadd.f32 %v248_v18, %v1356_v1  ;;  %v236_v29 = vmul.f32 %v223_v19, %v1369_v14  ;;  %v1380_v30 = vadd.f32 %v1319_v24, %v184_v23  ;;  %1103 = vtanh.f32 %v286_v22 }
  0xdf   :  { %v1098_v31 = vpop.eup %1097  ;;  %v962_v34 = vpop.f32.mrf.mxu0  ;;  %v230_v24 = vmul.f32 %v1407_v63, %v1407_v63  ;;  %v255_v17 = vmul.f32 0.044715, %v242_v9  ;;  %v293_v23 = vmul.f32 0.7978846, %v267_v16 }
  0xe0   :  { %v309_v36 = vadd.f32 1.0, %v1098_v31  ;;  %v287_v37 = vmul.f32 0.7978846, %v261_v28  ;;  %v249_v38 = vmul.f32 0.044715, %v236_v29  ;;  %v224_v41 = vmul.f32 %v1380_v30, %v1380_v30 }
  0xe1   :  { %v243_v18 = vmul.f32 %v230_v24, %v1407_v63  ;;  %v268_v25 = vadd.f32 %v255_v17, %v1394_v47  ;;  %v275_v28 = vmul.f32 0.5, %v1369_v14 }
  0xe2   :  { %v322_v43 = vmul.f32 %v309_v36, %v270_v35  ;;  %1105 = vtanh.f32 %v287_v37  ;;  %v262_v45 = vadd.f32 %v249_v38, %v1369_v14  ;;  %v237_v49 = vmul.f32 %v224_v41, %v1380_v30 }
  0xe3   :  { %v1100_v46 = vpop.eup %1099  ;;  %v256_v27 = vmul.f32 0.044715, %v243_v18  ;;  %v294_v34 = vmul.f32 0.7978846, %v268_v25  ;;  %v276_v37 = vmul.f32 0.5, %v1380_v30  ;;  %v277_v14 = vmul.f32 0.5, %v1340_v48 }
  0xe4   :  { %v288_v51 = vmul.f32 0.7978846, %v262_v45  ;;  %998 = vmatmul.mubr.msk.f32.vlgmr.msra.gmra.mxu1 %vm350_vm2, %v322_v43  ;;  %v310_v52 = vadd.f32 1.0, %v1100_v46  ;;  %v250_v55 = vmul.f32 0.044715, %v237_v49  ;;  %v279_v48 = vmul.f32 0.5, %v1365_v12 }
  0xe5   :  { %1000 = vmatprep.mubr.msk.f32.mxu1 %vm1150_vm0, %v1149_v0  ;;  %v269_v35 = vadd.f32 %v256_v27, %v1407_v63  ;;  %v281_v12 = vmul.f32 0.5, %v1394_v47  ;;  %v644_v47 = vld [vmem:[%s1670_s5 + $0x38] sm:$0xff] }
  0xe6   :  { %1107 = vtanh.f32 %v288_v51  ;;  %v323_v58 = vmul.f32 %v310_v52, %v271_v50  ;;  %v263_v62 = vadd.f32 %v250_v55, %v1380_v30  ;;  %v278_v30 = vmul.f32 0.5, %v1350_v59  ;;  %1037 = vmatpush3.msra.mxu0 %v644_v47 }
  0xe7   :  { %v1102_v60 = vpop.eup %1101  ;;  %1109 = vtanh.f32 %v290_v54  ;;  %v295_v40 = vmul.f32 0.7978846, %v269_v35  ;;  %v280_v59 = vmul.f32 0.5, %v1383_v32  ;;  %v282_v32 = vmul.f32 0.5, %v1407_v63  ;;  %1038 = vmatprep.subr.mxu0 %v1149_v0  ;;  %v641_v63 = vld [vmem:[%s1670_s5 + $0x20] sm:$0xff] }
  0xe8   :  { %1001 = vmatmul.mubr.msk.f32.gmra.mxu1 %vm350_vm2, %v323_v58  ;;  %v311_v3 = vadd.f32 1.0, %v1102_v60  ;;  %v289_v4 = vmul.f32 0.7978846, %v263_v62  ;;  %1039 = vmatpush3.msra.mxu0 %v643_v33  ;;  %v642_v62 = vld [vmem:[%s1670_s5 + $0x28] sm:$0xff] }
  0xe9   :  { %1003 = vmatprep.mubr.msk.f32.mxu1 %vm1150_vm0, %v1149_v0  ;;  %1040 = vmatprep.subr.mxu0 %v1149_v0 }
  0xea   :  { %v324_v7 = vmul.f32 %v311_v3, %v272_v2  ;;  %1111 = vtanh.f32 %v289_v4  ;;  %1041 = vmatpush3.msra.mxu0 %v642_v62  ;;  %v640_v2 = vld [vmem:[%s1670_s5 + $0x18] sm:$0xff]  ;;  %v639_v3 = vld [vmem:[%s1670_s5 + $0x10] sm:$0xff]  ;;  %v638_v4 = vld [vmem:[%s1670_s5 + $0x8] sm:$0xff] }
  0xeb   :  { %v1104_v42 = vpop.eup %1103  ;;  %1113 = vtanh.f32 %v291_v5  ;;  %1042 = vmatprep.subr.mxu0 %v1149_v0  ;;  %v637_v5 = vld [vmem:[%s1670_s5] sm:$0xff] }
  0xec   :  { %1004 = vmatmul.mubr.msk.f32.gmra.mxu1 %vm350_vm2, %v324_v7  ;;  %v312_v11 = vadd.f32 1.0, %v1104_v42  ;;  %1115 = vtanh.f32 %v292_v13  ;;  %1043 = vmatpush3.msra.mxu0 %v641_v63 }
  0xed   :  { %1006 = vmatprep.mubr.msk.f32.mxu1 %vm1150_vm0, %v1149_v0  ;;  %1117 = vtanh.f32 %v293_v23  ;;  %1044 = vmatprep.subr.mxu0 %v1149_v0 }
  0xee   :  { %v325_v19 = vmul.f32 %v312_v11, %v273_v10  ;;  %1119 = vtanh.f32 %v294_v34  ;;  %1045 = vmatpush3.msra.mxu0 %v640_v2 }
  0xef   :  { %v1106_v15 = vpop.eup %1105  ;;  %1121 = vtanh.f32 %v295_v40  ;;  %1046 = vmatprep.subr.mxu0 %v1149_v0 }
  0xf0   :  { %v313_v21 = vadd.f32 1.0, %v1106_v15  ;;  %1007 = vmatmul.mubr.msk.f32.gmra.mxu1 %vm350_vm2, %v325_v19  ;;  %1047 = vmatpush3.msra.mxu0 %v639_v3 }
  0xf1   :  { %1009 = vmatprep.mubr.msk.f32.mxu1 %vm1150_vm0, %v1149_v0  ;;  %1048 = vmatprep.subr.mxu0 %v1149_v0 }
  0xf2   :  { %v326_v53 = vmul.f32 %v313_v21, %v274_v20  ;;  %1049 = vmatpush3.msra.mxu0 %v638_v4 }
  0xf3   :  { %v1108_v22 = vpop.eup %1107  ;;  %1050 = vmatprep.subr.mxu0 %v1149_v0 }
  0xf4   :  { %v314_v29 = vadd.f32 1.0, %v1108_v22  ;;  %1010 = vmatmul.mubr.msk.f32.gmra.mxu1 %vm350_vm2, %v326_v53  ;;  %v1110_v31 = vpop.eup %1109  ;;  %1051 = vmatpush3.msra.mxu0 %v637_v5 }
  0xf5   :  { %1012 = vmatprep.mubr.msk.f32.mxu1 %vm1150_vm0, %v1149_v0  ;;  %v316_v43 = vadd.f32 1.0, %v1110_v31 }
  0xf6   :  { %v327_v1 = vmul.f32 %v314_v29, %v275_v28 }
  0xf7   :  { %v1112_v36 = vpop.eup %1111  ;;  %v329_v44 = vmul.f32 %v316_v43, %v277_v14 }
  0xf8   :  { %1013 = vmatmul.mubr.msk.f32.gmra.mxu1 %vm350_vm2, %v327_v1  ;;  %v315_v38 = vadd.f32 1.0, %v1112_v36  ;;  %v1114_v39 = vpop.eup %1113 }
  0xf9   :  { %1015 = vmatprep.mubr.msk.f32.mxu1 %vm1150_vm0, %v1149_v0  ;;  %v317_v45 = vadd.f32 1.0, %v1114_v39  ;;  %v1116_v46 = vpop.eup %1115 }
  0xfa   :  { %v328_v41 = vmul.f32 %v315_v38, %v276_v37  ;;  %v318_v49 = vadd.f32 1.0, %v1116_v46  ;;  %v1118_v50 = vpop.eup %1117 }
  0xfb   :  { %v330_v26 = vmul.f32 %v317_v45, %v278_v30  ;;  %v319_v52 = vadd.f32 1.0, %v1118_v50  ;;  %v1120_v54 = vpop.eup %1119 }
  0xfc   :  { %1016 = vmatmul.mubr.msk.f32.gmra.mxu1 %vm350_vm2, %v328_v41  ;;  %v331_v51 = vmul.f32 %v318_v49, %v279_v48  ;;  %v320_v56 = vadd.f32 1.0, %v1120_v54  ;;  %v1122_v57 = vpop.eup %1121 }
  0xfd   :  { %1018 = vmatprep.mubr.msk.f32.mxu1 %vm1150_vm0, %v1149_v0  ;;  %v332_v55 = vmul.f32 %v319_v52, %v280_v59  ;;  %v321_v60 = vadd.f32 1.0, %v1122_v57 }
  0xfe   :  { %v333_v58 = vmul.f32 %v320_v56, %v281_v12 }
  0xff   :  { %v334_v61 = vmul.f32 %v321_v60, %v282_v32 }
 0x100   :  { %1019 = vmatmul.mubr.msk.f32.gmra.mxu1 %vm350_vm2, %v329_v44 }
 0x101   :  { %1021 = vmatprep.mubr.msk.f32.mxu1 %vm1150_vm0, %v1149_v0 }
 0x104   :  { %1022 = vmatmul.mubr.msk.f32.gmra.mxu1 %vm350_vm2, %v330_v26 }
 0x105   :  { %1024 = vmatprep.mubr.msk.f32.mxu1 %vm1150_vm0, %v1149_v0 }
 0x108   :  { %1025 = vmatmul.mubr.msk.f32.gmra.mxu1 %vm350_vm2, %v331_v51 }
 0x109   :  { %1027 = vmatprep.mubr.msk.f32.mxu1 %vm1150_vm0, %v1149_v0 }
 0x10c   :  { %1028 = vmatmul.mubr.msk.f32.gmra.mxu1 %vm350_vm2, %v332_v55 }
 0x10d   :  { %1030 = vmatprep.mubr.msk.f32.mxu1 %vm1150_vm0, %v1149_v0 }
 0x110   :  { %1031 = vmatmul.mubr.msk.f32.gmra.mxu1 %vm350_vm2, %v333_v58 }
 0x111   :  { %1033 = vmatprep.mubr.msk.f32.mxu1 %vm1150_vm0, %v1149_v0 }
 0x114   :  { %1034 = vmatmul.mubr.msk.f32.gmra.mxu1 %vm350_vm2, %v334_v61 }
 0x1a4   :  { %v456_v7 = vpop.f32.mrf.mxu1 }
 0x1a5   :  { %v457_v8 = vadd.f32 %v1496_v6, %v456_v7 }
 0x1a6   :  { %v999_v9 = vpop.f32.mrf.mxu1 }
 0x1a7   :  { %v520_v24 = vmul.f32 %v457_v8, %v457_v8  ;;  %v572_v55 = vmul.f32 0.5, %v457_v8 }
 0x1a8   :  { %v461_v42 = vpop.f32.mrf.mxu1 }
 0x1a9   :  { %v533_v10 = vmul.f32 %v520_v24, %v457_v8  ;;  %v462_v11 = vadd.f32 %v1496_v6, %v461_v42 }
 0x1aa   :  { %v1002_v13 = vpop.f32.mrf.mxu1 }
 0x1ab   :  { %v546_v15 = vmul.f32 0.044715, %v533_v10  ;;  %v521_v16 = vmul.f32 %v462_v11, %v462_v11  ;;  %v573_v3 = vmul.f32 0.5, %v462_v11 }
 0x1ac   :  { %v466_v17 = vpop.f32.mrf.mxu1 }
 0x1ad   :  { %v559_v18 = vadd.f32 %v546_v15, %v457_v8  ;;  %v534_v19 = vmul.f32 %v521_v16, %v462_v11  ;;  %v1501_v20 = vadd.f32 %v1496_v6, %v466_v17 }
 0x1ae   :  { %v1005_v21 = vpop.f32.mrf.mxu1 }
 0x1af   :  { %v585_v53 = vmul.f32 0.7978846, %v559_v18  ;;  %v547_v22 = vmul.f32 0.044715, %v534_v19  ;;  %v522_v23 = vmul.f32 %v1501_v20, %v1501_v20  ;;  %v574_v16 = vmul.f32 0.5, %v1501_v20 }
 0x1b0   :  { %v471_v28 = vpop.f32.mrf.mxu1 }
 0x1b1   :  { %1123 = vtanh.f32 %v585_v53  ;;  %v560_v25 = vadd.f32 %v547_v22, %v462_v11  ;;  %v535_v27 = vmul.f32 %v522_v23, %v1501_v20  ;;  %v1507_v29 = vadd.f32 %v1496_v6, %v471_v28 }
 0x1b2   :  { %v1008_v34 = vpop.f32.mrf.mxu1 }
 0x1b3   :  { %v586_v1 = vmul.f32 0.7978846, %v560_v25  ;;  %v548_v31 = vmul.f32 0.044715, %v535_v27  ;;  %v523_v35 = vmul.f32 %v1507_v29, %v1507_v29 }
 0x1b4   :  { %v476_v37 = vpop.f32.mrf.mxu1 }
 0x1b5   :  { %1125 = vtanh.f32 %v586_v1  ;;  %v561_v36 = vadd.f32 %v548_v31, %v1501_v20  ;;  %v536_v38 = vmul.f32 %v523_v35, %v1507_v29  ;;  %v1514_v14 = vadd.f32 %v1496_v6, %v476_v37 }
 0x1b6   :  { %v1011_v40 = vpop.f32.mrf.mxu1 }
 0x1b7   :  { %v587_v39 = vmul.f32 0.7978846, %v561_v36  ;;  %v549_v41 = vmul.f32 0.044715, %v536_v38  ;;  %v524_v43 = vmul.f32 %v1514_v14, %v1514_v14  ;;  %v575_v36 = vmul.f32 0.5, %v1507_v29 }
 0x1b8   :  { %v481_v30 = vpop.f32.mrf.mxu1 }
 0x1b9   :  { %1127 = vtanh.f32 %v587_v39  ;;  %v562_v44 = vadd.f32 %v549_v41, %v1507_v29  ;;  %v537_v45 = vmul.f32 %v524_v43, %v1514_v14  ;;  %v1521_v46 = vadd.f32 %v1496_v6, %v481_v30 }
 0x1ba   :  { %v1014_v48 = vpop.f32.mrf.mxu1  ;;  %v576_v29 = vmul.f32 0.5, %v1514_v14 }
 0x1bb   :  { %v588_v26 = vmul.f32 0.7978846, %v562_v44  ;;  %v550_v49 = vmul.f32 0.044715, %v537_v45  ;;  %v525_v50 = vmul.f32 %v1521_v46, %v1521_v46 }
 0x1bc   :  { %v486_v59 = vpop.f32.mrf.mxu1 }
 0x1bd   :  { %1129 = vtanh.f32 %v588_v26  ;;  %v563_v52 = vadd.f32 %v550_v49, %v1514_v14  ;;  %v538_v54 = vmul.f32 %v525_v50, %v1521_v46  ;;  %v1528_v12 = vadd.f32 %v1496_v6, %v486_v59 }
 0x1be   :  { %v1124_v51 = vpop.eup %1123  ;;  %v1017_v57 = vpop.f32.mrf.mxu1 }
 0x1bf   :  { %v611_v56 = vadd.f32 1.0, %v1124_v51  ;;  %v589_v32 = vmul.f32 0.7978846, %v563_v52  ;;  %v551_v58 = vmul.f32 0.044715, %v538_v54  ;;  %v526_v60 = vmul.f32 %v1528_v12, %v1528_v12 }
 0x1c0   :  { %v491_v47 = vpop.f32.mrf.mxu1 }
 0x1c1   :  { %v624_v61 = vmul.f32 %v611_v56, %v572_v55  ;;  %1131 = vtanh.f32 %v589_v32  ;;  %v564_v62 = vadd.f32 %v551_v58, %v1521_v46  ;;  %v539_v63 = vmul.f32 %v526_v60, %v1528_v12 }
 0x1c2   :  { %v1126_v33 = vpop.eup %1125  ;;  %v1535_v2 = vadd.f32 %v1496_v6, %v491_v47  ;;  %v1020_v4 = vpop.f32.mrf.mxu1  ;;  %v577_v58 = vmul.f32 0.5, %v1521_v46  ;;  %v578_v46 = vmul.f32 0.5, %v1528_v12 }
 0x1c3   :  { %1053 = vmatmul.mubr.msk.f32.vlgmr.msra.gmra.mxu0 %vm350_vm2, %v624_v61  ;;  %v612_v5 = vadd.f32 1.0, %v1126_v33  ;;  %v590_v7 = vmul.f32 0.7978846, %v564_v62  ;;  %v552_v8 = vmul.f32 0.044715, %v539_v63 }
 0x1c4   :  { %v527_v9 = vmul.f32 %v1535_v2, %v1535_v2  ;;  %1055 = vmatprep.mubr.msk.f32.mxu0 %vm1150_vm0, %v1149_v0  ;;  %v496_v24 = vpop.f32.mrf.mxu1 }
 0x1c5   :  { %v625_v42 = vmul.f32 %v612_v5, %v573_v3  ;;  %1133 = vtanh.f32 %v590_v7  ;;  %v565_v13 = vadd.f32 %v552_v8, %v1528_v12  ;;  %v1545_v15 = vadd.f32 %v1496_v6, %v496_v24 }
 0x1c6   :  { %v1128_v10 = vpop.eup %1127  ;;  %v540_v11 = vmul.f32 %v527_v9, %v1535_v2  ;;  %v1023_v17 = vpop.f32.mrf.mxu1 }
 0x1c7   :  { %1056 = vmatmul.mubr.msk.f32.gmra.mxu0 %vm350_vm2, %v625_v42  ;;  %v613_v18 = vadd.f32 1.0, %v1128_v10  ;;  %v591_v19 = vmul.f32 0.7978846, %v565_v13  ;;  %v528_v53 = vmul.f32 %v1545_v15, %v1545_v15  ;;  %v579_v13 = vmul.f32 0.5, %v1535_v2 }
 0x1c8   :  { %v553_v21 = vmul.f32 0.044715, %v540_v11  ;;  %1058 = vmatprep.mubr.msk.f32.mxu0 %vm1150_vm0, %v1149_v0  ;;  %v501_v22 = vpop.f32.mrf.mxu1 }
 0x1c9   :  { %v626_v23 = vmul.f32 %v613_v18, %v574_v16  ;;  %1135 = vtanh.f32 %v591_v19  ;;  %v541_v27 = vmul.f32 %v528_v53, %v1545_v15  ;;  %v1556_v20 = vadd.f32 %v1496_v6, %v501_v22 }
 0x1ca   :  { %v566_v25 = vadd.f32 %v553_v21, %v1535_v2  ;;  %v1130_v28 = vpop.eup %1129  ;;  %v1026_v1 = vpop.f32.mrf.mxu1  ;;  %v580_v21 = vmul.f32 0.5, %v1545_v15 }
 0x1cb   :  { %1059 = vmatmul.mubr.msk.f32.gmra.mxu0 %vm350_vm2, %v626_v23  ;;  %v554_v34 = vmul.f32 0.044715, %v541_v27  ;;  %v529_v35 = vmul.f32 %v1556_v20, %v1556_v20  ;;  %v614_v38 = vadd.f32 1.0, %v1130_v28 }
 0x1cc   :  { %v592_v31 = vmul.f32 0.7978846, %v566_v25  ;;  %1061 = vmatprep.mubr.msk.f32.mxu0 %vm1150_vm0, %v1149_v0  ;;  %v506_v37 = vpop.f32.mrf.mxu1  ;;  %v581_v25 = vmul.f32 0.5, %v1556_v20 }
 0x1cd   :  { %v567_v39 = vadd.f32 %v554_v34, %v1545_v15  ;;  %v542_v40 = vmul.f32 %v529_v35, %v1556_v20  ;;  %v1567_v41 = vadd.f32 %v1496_v6, %v506_v37  ;;  %v627_v44 = vmul.f32 %v614_v38, %v575_v36 }
 0x1ce   :  { %1137 = vtanh.f32 %v592_v31  ;;  %v1132_v43 = vpop.eup %1131  ;;  %v1029_v30 = vpop.f32.mrf.mxu1 }
 0x1cf   :  { %v593_v45 = vmul.f32 0.7978846, %v567_v39  ;;  %v555_v48 = vmul.f32 0.044715, %v542_v40  ;;  %v530_v26 = vmul.f32 %v1567_v41, %v1567_v41  ;;  %1062 = vmatmul.mubr.msk.f32.gmra.mxu0 %vm350_vm2, %v627_v44  ;;  %v615_v50 = vadd.f32 1.0, %v1132_v43 }
 0x1d0   :  { %v511_v49 = vpop.f32.mrf.mxu1  ;;  %1064 = vmatprep.mubr.msk.f32.mxu0 %vm1150_vm0, %v1149_v0  ;;  %v582_v1 = vmul.f32 0.5, %v1567_v41  ;;  %v867_v43 = vld [vmem:[%s1672_s6] ss:$0 sm:$0xff] }
 0x1d1   :  { %1139 = vtanh.f32 %v593_v45  ;;  %v568_v59 = vadd.f32 %v555_v48, %v1556_v20  ;;  %v543_v51 = vmul.f32 %v530_v26, %v1567_v41  ;;  %v512_v52 = vadd.f32 %v1496_v6, %v511_v49 }
 0x1d2   :  { %v1134_v54 = vpop.eup %1133  ;;  %v1032_v55 = vpop.f32.mrf.mxu1  ;;  %v628_v56 = vmul.f32 %v615_v50, %v576_v29 }
 0x1d3   :  { %v594_v57 = vmul.f32 0.7978846, %v568_v59  ;;  %v556_v32 = vmul.f32 0.044715, %v543_v51  ;;  %v531_v14 = vmul.f32 %v512_v52, %v512_v52  ;;  %v616_v61 = vadd.f32 1.0, %v1134_v54 }
 0x1d4   :  { %1065 = vmatmul.mubr.msk.f32.gmra.mxu0 %vm350_vm2, %v628_v56  ;;  %v516_v60 = vpop.f32.mrf.mxu1  ;;  %v583_v36 = vmul.f32 0.5, %v512_v52 }
 0x1d5   :  { %1141 = vtanh.f32 %v594_v57  ;;  %v569_v47 = vadd.f32 %v556_v32, %v1567_v41  ;;  %v544_v33 = vmul.f32 %v531_v14, %v512_v52  ;;  %v517_v62 = vadd.f32 %v1496_v6, %v516_v60  ;;  %1067 = vmatprep.mubr.msk.f32.mxu0 %vm1150_vm0, %v1149_v0 }
 0x1d6   :  { %v1136_v63 = vpop.eup %1135  ;;  %v1035_v3 = vpop.f32.mrf.mxu1  ;;  %v629_v4 = vmul.f32 %v616_v61, %v577_v58 }
 0x1d7   :  { %v595_v5 = vmul.f32 0.7978846, %v569_v47  ;;  %v557_v7 = vmul.f32 0.044715, %v544_v33  ;;  %v532_v8 = vmul.f32 %v517_v62, %v517_v62  ;;  %v617_v9 = vadd.f32 1.0, %v1136_v63 }
 0x1d8   :  { %1068 = vmatmul.mubr.msk.f32.gmra.mxu0 %vm350_vm2, %v629_v4  ;;  %v584_v39 = vmul.f32 0.5, %v517_v62 }
 0x1d9   :  { %1143 = vtanh.f32 %v595_v5  ;;  %v570_v24 = vadd.f32 %v557_v7, %v512_v52  ;;  %v545_v42 = vmul.f32 %v532_v8, %v517_v62  ;;  %1070 = vmatprep.mubr.msk.f32.mxu0 %vm1150_vm0, %v1149_v0  ;;  %v630_v10 = vmul.f32 %v617_v9, %v578_v46 }
 0x1db   :  { %v1138_v6 = vpop.eup %1137  ;;  %v596_v11 = vmul.f32 0.7978846, %v570_v24  ;;  %v558_v16 = vmul.f32 0.044715, %v545_v42 }
 0x1dc   :  { %v618_v17 = vadd.f32 1.0, %v1138_v6  ;;  %1071 = vmatmul.mubr.msk.f32.gmra.mxu0 %vm350_vm2, %v630_v10 }
 0x1dd   :  { %1145 = vtanh.f32 %v596_v11  ;;  %v571_v12 = vadd.f32 %v558_v16, %v517_v62  ;;  %1073 = vmatprep.mubr.msk.f32.mxu0 %vm1150_vm0, %v1149_v0 }
 0x1de   :  { %v631_v18 = vmul.f32 %v618_v17, %v579_v13  ;;  %v1140_v19 = vpop.eup %1139 }
 0x1df   :  { %v597_v53 = vmul.f32 0.7978846, %v571_v12  ;;  %v619_v22 = vadd.f32 1.0, %v1140_v19 }
 0x1e0   :  { %1074 = vmatmul.mubr.msk.f32.gmra.mxu0 %vm350_vm2, %v631_v18 }
 0x1e1   :  { %1147 = vtanh.f32 %v597_v53  ;;  %1076 = vmatprep.mubr.msk.f32.mxu0 %vm1150_vm0, %v1149_v0  ;;  %v632_v2 = vmul.f32 %v619_v22, %v580_v21 }
 0x1e2   :  { %v1142_v23 = vpop.eup %1141 }
 0x1e3   :  { %v620_v27 = vadd.f32 1.0, %v1142_v23 }
 0x1e4   :  { %1077 = vmatmul.mubr.msk.f32.gmra.mxu0 %vm350_vm2, %v632_v2 }
 0x1e5   :  { %1079 = vmatprep.mubr.msk.f32.mxu0 %vm1150_vm0, %v1149_v0  ;;  %v633_v28 = vmul.f32 %v620_v27, %v581_v25 }
 0x1e6   :  { %v1144_v15 = vpop.eup %1143 }
 0x1e7   :  { %v621_v31 = vadd.f32 1.0, %v1144_v15 }
 0x1e8   :  { %1080 = vmatmul.mubr.msk.f32.gmra.mxu0 %vm350_vm2, %v633_v28 }
 0x1e9   :  { %1082 = vmatprep.mubr.msk.f32.mxu0 %vm1150_vm0, %v1149_v0  ;;  %v634_v34 = vmul.f32 %v621_v31, %v582_v1 }
 0x1ea   :  { %v1146_v35 = vpop.eup %1145 }
 0x1eb   :  { %v622_v20 = vadd.f32 1.0, %v1146_v35 }
 0x1ec   :  { %1083 = vmatmul.mubr.msk.f32.gmra.mxu0 %vm350_vm2, %v634_v34 }
 0x1ed   :  { %1085 = vmatprep.mubr.msk.f32.mxu0 %vm1150_vm0, %v1149_v0  ;;  %v635_v37 = vmul.f32 %v622_v20, %v583_v36 }
 0x1ee   :  { %v1148_v38 = vpop.eup %1147 }
 0x1ef   :  { %v623_v40 = vadd.f32 1.0, %v1148_v38 }
 0x1f0   :  { %1086 = vmatmul.mubr.msk.f32.gmra.mxu0 %vm350_vm2, %v635_v37 }
 0x1f1   :  { %1088 = vmatprep.mubr.msk.f32.mxu0 %vm1150_vm0, %v1149_v0  ;;  %v636_v41 = vmul.f32 %v623_v40, %v584_v39 }
 0x1f4   :  { %1089 = vmatmul.mubr.msk.f32.gmra.mxu0 %vm350_vm2, %v636_v41 }
 0x283   :  { %v757_v30 = vpop.f32.mrf.mxu0 }
 0x284   :  { %v758_v44 = vadd.f32 %v867_v43, %v757_v30 }
 0x285   :  { %v1054_v45 = vpop.f32.mrf.mxu0 }
 0x286   :  { %822 = vst.msk [vmem:[%s1673_s7] sm:$0xff] %vm821_vm3, %v758_v44 }
 0x287   :  { %v762_v48 = vpop.f32.mrf.mxu0 }
 0x288   :  { %v763_v26 = vadd.f32 %v867_v43, %v762_v48 }
 0x289   :  { %v1057_v29 = vpop.f32.mrf.mxu0 }
 0x28a   :  { %823 = vst.msk [vmem:[%s1673_s7 + $0x8] sm:$0xff] %vm821_vm3, %v763_v26 }
 0x28b   :  { %v767_v0 = vpop.f32.mrf.mxu0 }
 0x28c   :  { %v768_v49 = vadd.f32 %v867_v43, %v767_v0 }
 0x28d   :  { %v1060_v50 = vpop.f32.mrf.mxu0 }
 0x28e   :  { %824 = vst.msk [vmem:[%s1673_s7 + $0x10] sm:$0xff] %vm821_vm3, %v768_v49 }
 0x28f   :  { %v772_v59 = vpop.f32.mrf.mxu0 }
 0x290   :  { %v773_v51 = vadd.f32 %v867_v43, %v772_v59 }
 0x291   :  { %v1063_v52 = vpop.f32.mrf.mxu0 }
 0x292   :  { %825 = vst.msk [vmem:[%s1673_s7 + $0x18] sm:$0xff] %vm821_vm3, %v773_v51 }
 0x294   :  { %v777_v54 = vpop.f32.mrf.mxu0 }
 0x295   :  { %v778_v55 = vadd.f32 %v867_v43, %v777_v54 }
 0x296   :  { %v1066_v56 = vpop.f32.mrf.mxu0 }
 0x297   :  { %826 = vst.msk [vmem:[%s1673_s7 + $0x20] sm:$0xff] %vm821_vm3, %v778_v55 }
 0x298   :  { %v782_v57 = vpop.f32.mrf.mxu0 }
 0x299   :  { %v783_v32 = vadd.f32 %v867_v43, %v782_v57 }
 0x29a   :  { %v1069_v14 = vpop.f32.mrf.mxu0 }
 0x29b   :  { %827 = vst.msk [vmem:[%s1673_s7 + $0x28] sm:$0xff] %vm821_vm3, %v783_v32 }
 0x29c   :  { %v787_v58 = vpop.f32.mrf.mxu0 }
 0x29d   :  { %v788_v60 = vadd.f32 %v867_v43, %v787_v58 }
 0x29e   :  { %v1072_v61 = vpop.f32.mrf.mxu0 }
 0x29f   :  { %828 = vst.msk [vmem:[%s1673_s7 + $0x30] sm:$0xff] %vm821_vm3, %v788_v60 }
 0x2a0   :  { %v792_v47 = vpop.f32.mrf.mxu0 }
 0x2a1   :  { %v793_v33 = vadd.f32 %v867_v43, %v792_v47 }
 0x2a2   :  { %v1075_v62 = vpop.f32.mrf.mxu0 }
 0x2a3   :  { %829 = vst.msk [vmem:[%s1673_s7 + $0x38] sm:$0xff] %vm821_vm3, %v793_v33 }
 0x2a4   :  { %v797_v63 = vpop.f32.mrf.mxu0 }
 0x2a5   :  { %v798_v3 = vadd.f32 %v867_v43, %v797_v63 }
 0x2a6   :  { %v1078_v4 = vpop.f32.mrf.mxu0 }
 0x2a7   :  { %830 = vst.msk [vmem:[%s1673_s7 + $0x40] sm:$0xff] %vm821_vm3, %v798_v3 }
 0x2a8   :  { %v802_v5 = vpop.f32.mrf.mxu0 }
 0x2a9   :  { %v803_v7 = vadd.f32 %v867_v43, %v802_v5 }
 0x2aa   :  { %v1081_v8 = vpop.f32.mrf.mxu0 }
 0x2ab   :  { %831 = vst.msk [vmem:[%s1673_s7 + $0x48] sm:$0xff] %vm821_vm3, %v803_v7 }
 0x2ac   :  { %v807_v46 = vpop.f32.mrf.mxu0 }
 0x2ad   :  { %v808_v9 = vadd.f32 %v867_v43, %v807_v46 }
 0x2ae   :  { %v1084_v24 = vpop.f32.mrf.mxu0 }
 0x2af   :  { %832 = vst.msk [vmem:[%s1673_s7 + $0x50] sm:$0xff] %vm821_vm3, %v808_v9 }
 0x2b0   :  { %v812_v42 = vpop.f32.mrf.mxu0 }
 0x2b1   :  { %v813_v6 = vadd.f32 %v867_v43, %v812_v42 }
 0x2b2   :  { %v1087_v10 = vpop.f32.mrf.mxu0 }
 0x2b3   :  { %833 = vst.msk [vmem:[%s1673_s7 + $0x58] sm:$0xff] %vm821_vm3, %v813_v6 }
 0x2b4   :  { %v817_v13 = vpop.f32.mrf.mxu0 }
 0x2b5   :  { %v818_v11 = vadd.f32 %v867_v43, %v817_v13 }
 0x2b6   :  { %v1090_v16 = vpop.f32.mrf.mxu0 }
 0x2b7   :  { %834 = vst.msk [vmem:[%s1673_s7 + $0x60] sm:$0xff] %vm821_vm3, %v818_v11 }

</bundles_post_ra>
